<compile_context>
chip_gen: v7x
topology: tpu7x:2x2x1
jax: 0.10.0
libtpu: 0.0.40
codegen_flags: <defaults>
</compile_context>

<pallas_src>
import functools

import jax
import jax.numpy as jnp
from jax import lax
from jax.experimental import pallas as pl
from jax.experimental.pallas import tpu as pltpu


def _round_up(x: int, m: int) -> int:
    return ((x + m - 1) // m) * m


def _linear_logsoftmax_kernel(x_ref, w_ref, b_ref, o_ref):
    # x_ref: (TB, E), w_ref: (L, E), b_ref: (1, L), o_ref: (TB, L)
    x = x_ref[...]                       # keep native dtype (f32 / bf16)
    w = w_ref[...]
    b = b_ref[...].astype(jnp.float32)

    # logits = x @ W^T + b  -- contract E of both operands (MXU handles the
    # transposed RHS natively; f32 accumulation).
    logits = lax.dot_general(
        x, w,
        dimension_numbers=(((1,), (1,)), ((), ())),
        preferred_element_type=jnp.float32,
    ) + b

    # Numerically stable log_softmax over the label axis (dim=1).
    m = jnp.max(logits, axis=-1, keepdims=True)
    shifted = logits - m
    lse = jnp.log(jnp.sum(jnp.exp(shifted), axis=-1, keepdims=True))
    o_ref[...] = (shifted - lse).astype(o_ref.dtype)


@functools.partial(jax.jit, static_argnames=("max_tile_rows",))
def model_forward(embeds, weight, bias, *, max_tile_rows: int = 512):
    """embeds: (B, E); weight: (L, E) (PyTorch nn.Linear layout); bias: (L,)."""
    B, E = embeds.shape
    L = weight.shape[0]
    x_itemsize = jnp.dtype(embeds.dtype).itemsize
    w_itemsize = jnp.dtype(weight.dtype).itemsize

    # ---- choose a batch tile: multiple of 8 (f32 sublane), capped so the
    # double-buffered activation slab stays well inside scoped VMEM.
    act_budget = 48 * 1024 * 1024                      # conservative for v7x 64 MiB
    tb_cap = max(8, (act_budget // (2 * E * x_itemsize)) // 8 * 8)
    TB = min(_round_up(B, 8), max_tile_rows, tb_cap)
    TB = max(8, TB)

    # ---- pad batch so the grid divides evenly (padded rows sliced off after).
    B_pad = _round_up(B, TB)
    if B_pad != B:
        embeds = jnp.pad(embeds, ((0, B_pad - B), (0, 0)))

    b2d = bias.reshape(1, L)
    grid = (B_pad // TB,)

    # ---- VMEM: 2x activation tile + 2x output tile + resident weight/bias.
    vmem_bytes = (2 * TB * E * x_itemsize
                  + 2 * TB * L * 4
                  + L * E * w_itemsize
                  + L * 4
                  + (4 << 20))                         # headroom
    vmem_bytes = int(min(max(vmem_bytes, 32 << 20), 100 << 20))

    cost = pl.CostEstimate(
        flops=2 * B_pad * E * L,
        transcendentals=B_pad * L,                     # exp per logit
        bytes_accessed=(B_pad * E * x_itemsize
                        + L * E * w_itemsize
                        + L * 4
                        + B_pad * L * 4),
    )

    out = pl.pallas_call(
        _linear_logsoftmax_kernel,
        out_shape=jax.ShapeDtypeStruct((B_pad, L), jnp.float32),
        grid=grid,
        in_specs=[
            pl.BlockSpec((TB, E), lambda i: (i, 0)),   # streamed activations
            pl.BlockSpec((L, E), lambda i: (0, 0)),    # resident weight (full array)
            pl.BlockSpec((1, L), lambda i: (0, 0)),    # resident bias (full array)
        ],
        out_specs=pl.BlockSpec((TB, L), lambda i: (i, 0)),
        compiler_params=pltpu.CompilerParams(
            dimension_semantics=("parallel",),
            vmem_limit_bytes=vmem_bytes,
        ),
        cost_estimate=cost,
    )(embeds, weight, b2d)

    return out[:B] if B_pad != B else out


def _reference(embeds, weight, bias):
    logits = embeds.astype(jnp.float32) @ weight.astype(jnp.float32).T + bias
    return jax.nn.log_softmax(logits, axis=1)


if __name__ == "__main__":
    # Small shapes consistent with the module: rt-polarity has 2 labels.
    batch = 8
    embeddings_size = 32
    num_labels = 2

    key = jax.random.PRNGKey(0)
    k1, k2, k3, k4 = jax.random.split(key, 4)

    embeds = jax.random.normal(k1, (batch, embeddings_size), dtype=jnp.float32)
    # Deterministic "nn.Linear" parameter init (uniform in +-1/sqrt(fan_in)).
    bound = 1.0 / jnp.sqrt(jnp.float32(embeddings_size))
    weight = jax.random.uniform(
        k2, (num_labels, embeddings_size), minval=-bound, maxval=bound,
        dtype=jnp.float32,
    )
    bias = jax.random.uniform(
        k3, (num_labels,), minval=-bound, maxval=bound, dtype=jnp.float32
    )

    out = model_forward(embeds, weight, bias)
    out = jax.block_until_ready(out)
    ref = _reference(embeds, weight, bias)
    assert out.shape == (batch, num_labels)
    assert jnp.allclose(out, ref, atol=1e-5, rtol=1e-5)

    # Also exercise the batch-tiled / padded path with a non-multiple-of-8 batch.
    embeds2 = jax.random.normal(k4, (13, embeddings_size), dtype=jnp.float32)
    out2 = jax.block_until_ready(model_forward(embeds2, weight, bias))
    ref2 = _reference(embeds2, weight, bias)
    assert out2.shape == (13, num_labels)
    assert jnp.allclose(out2, ref2, atol=1e-5, rtol=1e-5)

    print("KERNEL_OK")
</pallas_src>

<mosaic_0001>
module attributes {stable_mosaic.version = 11 : i64} {
  func.func @_linear_logsoftmax_kernel(%arg0: i32, %arg1: memref<8x32xf32, #tpu.memory_space<vmem>>, %arg2: memref<2x32xf32, #tpu.memory_space<vmem>>, %arg3: memref<1x2xf32, #tpu.memory_space<vmem>>, %arg4: memref<8x2xf32, #tpu.memory_space<vmem>>) attributes {dimension_semantics = [#tpu.dimension_semantics<parallel>], iteration_bounds = array<i64: 1>, scalar_prefetch = 0 : i64, scratch_operands = 0 : i64, tpu.core_type = #tpu.core_type<tc>, window_params = [{transform_indices = @transform_0, window_bounds = array<i64: 8, 32>}, {pipeline_mode = #tpu.pipeline_mode<synchronous>, transform_indices = @transform_1, window_bounds = array<i64: 2, 32>}, {pipeline_mode = #tpu.pipeline_mode<synchronous>, transform_indices = @transform_2, window_bounds = array<i64: 1, 2>}, {transform_indices = @transform_3, window_bounds = array<i64: 8, 2>}]} {
    %c0 = arith.constant 0 : index
    %c0_0 = arith.constant 0 : index
    %0 = vector.load %arg1[%c0, %c0_0] : memref<8x32xf32, #tpu.memory_space<vmem>>, vector<8x32xf32>
    %c0_1 = arith.constant 0 : index
    %c0_2 = arith.constant 0 : index
    %1 = vector.load %arg2[%c0_1, %c0_2] : memref<2x32xf32, #tpu.memory_space<vmem>>, vector<2x32xf32>
    %c0_3 = arith.constant 0 : index
    %c0_4 = arith.constant 0 : index
    %2 = vector.load %arg3[%c0_3, %c0_4] : memref<1x2xf32, #tpu.memory_space<vmem>>, vector<1x2xf32>
    %cst = arith.constant dense<0.000000e+00> : vector<8x2xf32>
    %3 = tpu.matmul %0, %1, %cst {dimension_numbers = #tpu.dot_dimension_numbers<[1], [1], [0], [0], [0, 0, 1, 0], [], []>} : vector<8x32xf32>, vector<2x32xf32>, vector<8x2xf32> -> vector<8x2xf32>
    %4 = vector.broadcast %2 : vector<1x2xf32> to vector<8x2xf32>
    %5 = arith.addf %3, %4 : vector<8x2xf32>
    %cst_5 = arith.constant dense<0xFF800000> : vector<8xf32>
    %6 = vector.multi_reduction <maximumf>, %5, %cst_5 [1] : vector<8x2xf32> to vector<8xf32>
    %7 = vector.shape_cast %6 : vector<8xf32> to vector<8x1xf32>
    %8 = vector.broadcast %7 : vector<8x1xf32> to vector<8x2xf32>
    %9 = arith.subf %5, %8 : vector<8x2xf32>
    %10 = math.exp %9 : vector<8x2xf32>
    %cst_6 = arith.constant dense<0.000000e+00> : vector<8xf32>
    %11 = vector.multi_reduction <add>, %10, %cst_6 [1] : vector<8x2xf32> to vector<8xf32>
    %12 = vector.shape_cast %11 : vector<8xf32> to vector<8x1xf32>
    %13 = math.log %12 : vector<8x1xf32>
    %14 = vector.broadcast %13 : vector<8x1xf32> to vector<8x2xf32>
    %15 = arith.subf %9, %14 : vector<8x2xf32>
    %c0_7 = arith.constant 0 : index
    %c0_8 = arith.constant 0 : index
    %16 = vector.load %arg4[%c0_7, %c0_8] : memref<8x2xf32, #tpu.memory_space<vmem>>, vector<8x2xf32>
    tpu.vector_store %arg4[%c0_7, %c0_8], %15 {strides = array<i32>} : memref<8x2xf32, #tpu.memory_space<vmem>>, vector<8x2xf32>,
    return
  }
  func.func @transform_0(%arg0: i32) -> (i32, i32) {
    %c0_i32 = arith.constant 0 : i32
    %c0_i32_0 = arith.constant 0 : i32
    return %arg0, %c0_i32 : i32, i32
  }
  func.func @transform_1(%arg0: i32) -> (i32, i32) {
    %c0_i32 = arith.constant 0 : i32
    %c0_i32_0 = arith.constant 0 : i32
    %c0_i32_1 = arith.constant 0 : i32
    return %c0_i32, %c0_i32_0 : i32, i32
  }
  func.func @transform_2(%arg0: i32) -> (i32, i32) {
    %c0_i32 = arith.constant 0 : i32
    %c0_i32_0 = arith.constant 0 : i32
    %c0_i32_1 = arith.constant 0 : i32
    return %c0_i32, %c0_i32_0 : i32, i32
  }
  func.func @transform_3(%arg0: i32) -> (i32, i32) {
    %c0_i32 = arith.constant 0 : i32
    %c0_i32_0 = arith.constant 0 : i32
    return %arg0, %c0_i32 : i32, i32
  }
}

</mosaic_0001>

<bundles_post_ra>
// kernel: model_forward.1
= control target key start
LH: loop header
LB: loop body
LE: loop exit
PB: predicated region body
PF: predicated region fallthrough
CT: control target
= control target key end

     0   :  { %8 = vsyncpa [#allocation3], 0  ;;  %s172_s12 = smov [#allocation2]   ;;  %s219_s0 = inlined_call_operand.hbm [shape: f32[8,32], index: 0, kind: input, shape index: {}]   ;;  %s220_s1 = inlined_call_operand.vmem [shape: f32[2,32], index: 1, kind: input, shape index: {}]   ;;  %s221_s2 = inlined_call_operand.vmem [shape: f32[1,2], index: 2, kind: input, shape index: {}]   ;;  %s222_s3 = inlined_call_operand.vmem [shape: f32[8,2], index: 3, kind: output, shape index: {}]  }
   0x1   :  { %s15_s13 = sshll.u32 %s172_s12, 4  ;;  %s148_s16 = scalar_lea.hbm %s219_s0, 128  ;;  %s16_s13 = int_to_ptr.vmem [resolvable:$true] %s15_s13 }
   0x2   :  { %p149_p0 = scmp.ne.s32.totalorder %s219_s0, %s148_s16  ;;  %p152_p1 = scmp.lt.u32.totalorder %s148_s16, %s219_s0 }
   0x4   :  { %p154_p2 = pnand %p152_p1, %p149_p0 }
   0x6   :  { %157 = shalt.err (!%p154_p2)
}
   0x7   :  { %s158_s21 = scalar_lea.vmem %s16_s13, 128  ;;  %p163_p4 = scmp.lt.s32.totalorder %s16_s13, %s16_s13 }
   0x8   :  { %p159_p3 = scmp.ne.s32.totalorder %s16_s13, %s158_s21  ;;  %p164_p5 = scmp.lt.s32.totalorder %s158_s21, %s158_s21 }
   0xa   :  { %p165_p6 = por %p164_p5, %p163_p4 }
   0xc   :  { %p166_p7 = pnand %p165_p6, %p159_p3 }
   0xe   :  { %169 = shalt.err (!%p166_p7)
}
   0xf   :  { %18 = dma.hbm_to_vmem [thread:$0]  %s219_s0, 128, %s16_s13, [#allocation3]  }
  0x10   :  { %170 = dma.done.wait [#allocation3], 128  }
  0x11   :  { %171 = vsyncadd [#allocation3], 4294967168  ;;  %v173_v0 = vmov 0.0   ;;  %vm174_vm0 = vmmov 0   ;;  %vm35_vm1 = vcmask 261120   ;;  %v26_v2 = vld [vmem:[#allocation2] sm:$0xff] }
  0x12   :  { %136 = vmatprep.subr.mxu0 %v173_v0  ;;  %138 = vmatprep.mubr.msk.f32.mxu0 %vm174_vm0, %v173_v0  ;;  %v27_v1 = vld [vmem:[%s220_s1] sm:$0x3]  ;;  %vm112_vm2 = vcmask 15360  }
  0x13   :  { %137 = vmatpush3.xpose.msk.msra.mxu0 %vm35_vm1, %v27_v1  ;;  %v131_v3 = vld [vmem:[%s221_s2] ss:$0 sm:$0xff] }
  0x16   :  { %139 = vmatmul.mubr.msk.f32.vlgmr.msra.gmra.mrb[0].mxu0 %vm35_vm1, %v26_v2 }
  0xe9   :  { %v108_v4 = vpop.f32.mrb[0].mxu0 }
  0xea   :  { %v109_v5 = vadd.f32 %v131_v3, %v108_v4  ;;  %v140_v6 = vpop.f32.mrb[1].mxu0 }
  0xec   :  { %v113_v7 = vsel %vm112_vm2, %v109_v5, -inf }
  0xed   :  { %114 = vmax.xlane.f32.xlu0 %v113_v7 }
 0x17a   :  { %v115_v8 = vpop.xlane.xlu0 %114 }
 0x17b   :  { %v116_v9 = vsub.f32 %v109_v5, %v115_v8 }
 0x17d   :  { %v117_v10 = vmul.f32 1.442695, %v116_v9 }
 0x17f   :  { %144 = vpow2.f32 %v117_v10 }
 0x189   :  { %v145_v11 = vpop.eup %144 }
 0x18a   :  { %v119_v12 = vsel %vm112_vm2, %v145_v11, 0.0 }
 0x18b   :  { %120 = vadd.xlane.f32.xlu0 %v119_v12 }
 0x218   :  { %v121_v13 = vpop.xlane.xlu0 %120 }
 0x219   :  { %146 = vlog2.f32 %v121_v13 }
 0x223   :  { %v147_v14 = vpop.eup %146 }
 0x224   :  { %v123_v15 = vmul.f32 0.6931472, %v147_v14 }
 0x226   :  { %v124_v16 = vsub.f32 %v116_v9, %v123_v15 }
 0x228   :  { %125 = vst.msk [vmem:[%s222_s3] sm:$0xff] %vm112_vm2, %v124_v16 }
 0x229   :  { %130 = vsyncpa [#allocation3], 1 }

</bundles_post_ra>
